<compile_context>
chip_gen: v5e
topology: v5e:2x2
jax: 0.10.0
libtpu: 0.0.40
codegen_flags: <defaults>
</compile_context>

<pallas_src>
import math

import jax
import jax.numpy as jnp
from jax import lax
from jax.experimental import pallas as pl
from jax.experimental.pallas import tpu as pltpu


def _round_up(v, m):
    return (v + m - 1) // m * m


def _tpu_generation():
    """Best-effort TPU generation (4/5/6/7); 0 if unknown."""
    try:
        kind = jax.devices()[0].device_kind.lower()
    except Exception:
        return 0
    for g in (7, 6, 5, 4):
        if ("v%d" % g) in kind:
            return g
    return 0


# ----------------------------------------------------------------------------
# Glue: PyG gcn_norm (add self loops, symmetric normalization) -> dense A_hat
# ----------------------------------------------------------------------------
def gcn_norm_dense(edge_index, edge_weight, num_nodes, padded_nodes=None):
    """Dense normalized adjacency: A_hat[i, j] = d_i^-1/2 * w_ij * d_j^-1/2.

    Matches torch_geometric gcn_norm with add_self_loops=True, improved=False
    (self-loop weight 1.0).  Assumes the edge list contains no self loops.
    Padded rows/cols (>= num_nodes) are all-zero, so padded nodes never
    influence real nodes.
    """
    if padded_nodes is None:
        padded_nodes = num_nodes
    loop_idx = jnp.arange(num_nodes, dtype=edge_index.dtype)
    row = jnp.concatenate([edge_index[0], loop_idx])
    col = jnp.concatenate([edge_index[1], loop_idx])
    w = jnp.concatenate(
        [edge_weight, jnp.ones((num_nodes,), edge_weight.dtype)])
    deg = jnp.zeros((padded_nodes,), w.dtype).at[col].add(w)
    deg_inv_sqrt = jnp.where(deg > 0, 1.0 / jnp.sqrt(deg), 0.0)
    norm = deg_inv_sqrt[row] * w * deg_inv_sqrt[col]
    # aggregation target is `col` (flow source_to_target): A_hat[col, row]
    a_hat = jnp.zeros((padded_nodes, padded_nodes), w.dtype).at[col, row].add(norm)
    return a_hat


# ----------------------------------------------------------------------------
# Pallas kernel: grid = (num_layers + 1, num_row_tiles)
# ----------------------------------------------------------------------------
def make_gcn2net_kernel(num_layers, alpha, tm, a_resident):
    alpha = float(alpha)

    def kernel(betas_ref,        # SMEM (L,) f32
               a_ref,            # VMEM bf16: (Np, Np) resident, or (TM, Np) tile
               x_ref,            # VMEM (TM, Fp) bf16
               w_in_ref,         # VMEM (Fp, Hp) bf16
               b_in_ref,         # VMEM (1, Hp) f32
               w_l_ref,          # VMEM (Hp, Hp) bf16   -- current layer weight
               w_out_ref,        # VMEM (Hp, Op) bf16
               b_out_ref,        # VMEM (1, Op) f32
               out_ref,          # VMEM (TM, Op) f32
               h0_ref,           # scratch VMEM (Np, Hp) bf16  (residual)
               hbuf_ref):        # scratch VMEM (2, Np, Hp) bf16 (ping-pong)
        l = pl.program_id(0)                     # phase: 0 = init, 1..L = conv
        i = pl.program_id(1)                     # row tile
        rows = pl.ds(pl.multiple_of(i * tm, tm), tm)

        # ---- phase 0: init Linear; also seed the ping-pong buffer (h == h0)
        @pl.when(l == 0)
        def _init():
            h0 = jnp.dot(x_ref[...], w_in_ref[...],
                         preferred_element_type=jnp.float32) + b_in_ref[...]
            h0_bf = h0.astype(jnp.bfloat16)
            h0_ref[rows, :] = h0_bf
            hbuf_ref[0, rows, :] = h0_bf

        # ---- phases 1..L: GCN2Conv (shared_weights=True) + ReLU, with the
        #      final Linear fused at l == num_layers.  Dropout is identity
        #      (eval mode).
        @pl.when(l > 0)
        def _conv():
            layer = l - 1                         # 0-based conv layer index
            beta = betas_ref[layer]               # log(theta/(layer+1) + 1)
            src = lax.rem(layer, 2)               # ping-pong slot (dynamic)
            dst = 1 - src
            h_prev = hbuf_ref[src]                # full (Np, Hp) bf16
            a_tile = a_ref[rows, :] if a_resident else a_ref[...]
            # TODO(synk): for v7x with large N, K-tile this aggregation
            # (pltpu.emit_pipeline over A_hat columns) to decouple VMEM from N.
            agg = jnp.dot(a_tile, h_prev,
                          preferred_element_type=jnp.float32)     # (TM, Hp)
            mix = (1.0 - alpha) * agg + \
                alpha * h0_ref[rows, :].astype(jnp.float32)
            out = (1.0 - beta) * mix + beta * jnp.dot(
                mix.astype(jnp.bfloat16), w_l_ref[...],
                preferred_element_type=jnp.float32)
            h_new = jnp.maximum(out, 0.0)
            # TODO(synk): training-mode F.dropout would need pltpu PRNG; the
            # module is evaluated here with training=False (identity).

            @pl.when(l < num_layers)              # skip dead store at last layer
            def _store_h():
                hbuf_ref[dst, rows, :] = h_new.astype(jnp.bfloat16)

            @pl.when(l == num_layers)             # fused final Linear
            def _final():
                out_ref[...] = jnp.dot(
                    h_new.astype(jnp.bfloat16), w_out_ref[...],
                    preferred_element_type=jnp.float32) + b_out_ref[...]

    return kernel


def gcn2net_forward(x, edge_index, edge_weight, params, *,
                    num_layers, alpha, theta):
    n, f = x.shape
    h = params["w_in"].shape[1]
    o = params["w_out"].shape[1]

    gen = _tpu_generation()
    # v6e/v7x MXU is 2x256^2: TM=256 fills its M dimension; v5e (4x128^2)
    # prefers 128.  Small graphs use a single tile covering all (padded) nodes.
    tm_pref = 256 if gen >= 6 else 128
    tm = tm_pref if n >= tm_pref else _round_up(n, 16)
    np_ = _round_up(n, tm)
    fp = _round_up(f, 128)
    hp = _round_up(h, 128)
    op = _round_up(o, 128)                            # lane-dense output
    num_tiles = np_ // tm
    last_tile = num_tiles - 1

    # Per-chip VMEM cap with headroom (physical: 128 MiB v5e/v6e, 64 MiB v7x).
    if gen >= 7:
        vmem_cap = 52 * 1024 * 1024
    elif gen in (5, 6):
        vmem_cap = 108 * 1024 * 1024
    else:
        vmem_cap = 64 * 1024 * 1024

    def budget(resident):
        a_rows = np_ if resident else tm
        return (2 * a_rows * np_ * 2                       # A_hat (bf16, 2 bufs)
                + 2 * tm * fp * 2                          # x tile
                + 2 * (fp * hp + hp * hp + hp * op) * 2    # W_in, W_l, W_out
                + 2 * (hp + op) * 4                        # biases
                + 2 * tm * op * 4                          # out tile (f32)
                + 3 * np_ * hp * 2)                        # h0 + hbuf (bf16)

    # Keep A_hat fully resident in VMEM when it fits; otherwise stream row
    # tiles (re-fetched once per layer).
    a_resident = budget(True) + (4 << 20) <= vmem_cap
    vmem_bytes = budget(a_resident)
    vmem_limit = int(min(max(vmem_bytes + (4 << 20), 16 << 20), vmem_cap))

    # Build padded, bf16 MXU operands (zero padding keeps real rows exact:
    # padded nodes have all-zero adjacency rows/cols, so they never leak into
    # real rows; padded output rows are sliced off at the end).
    a_hat = gcn_norm_dense(edge_index, edge_weight, n, np_).astype(jnp.bfloat16)
    x_p = jnp.pad(x, ((0, np_ - n), (0, fp - f))).astype(jnp.bfloat16)
    w_in = jnp.pad(params["w_in"], ((0, fp - f), (0, hp - h))).astype(jnp.bfloat16)
    b_in = jnp.pad(params["b_in"], ((0, 0), (0, hp - h))).astype(jnp.float32)
    w_layers = jnp.pad(params["w_layers"],
                       ((0, 0), (0, hp - h), (0, hp - h))).astype(jnp.bfloat16)
    w_out = jnp.pad(params["w_out"], ((0, hp - h), (0, op - o))).astype(jnp.bfloat16)
    b_out = jnp.pad(params["b_out"], ((0, 0), (0, op - o))).astype(jnp.float32)
    betas = jnp.array([math.log(theta / (l + 1) + 1.0) for l in range(num_layers)],
                      jnp.float32)

    if a_resident:
        # Constant block index: the whole A_hat is DMA'd once and stays in
        # VMEM for the entire grid (no per-layer re-streaming).
        a_spec = pl.BlockSpec((np_, np_), lambda l, i: (0, 0))
    else:
        a_spec = pl.BlockSpec((tm, np_), lambda l, i: (i, 0))

    kernel = make_gcn2net_kernel(num_layers, alpha, tm, a_resident)
    grid = (num_layers + 1, num_tiles)

    out = pl.pallas_call(
        kernel,
        out_shape=jax.ShapeDtypeStruct((np_, op), jnp.float32),
        grid=grid,
        in_specs=[
            pl.BlockSpec(memory_space=pltpu.MemorySpace.SMEM),          # betas
            a_spec,                                                     # A_hat
            # x is only consumed at l == 0: freeze the block index afterwards
            # so Pallas does not re-DMA x on every layer phase.
            pl.BlockSpec((tm, fp),
                         lambda l, i: (jnp.where(l == 0, i, last_tile), 0)),
            pl.BlockSpec((fp, hp), lambda l, i: (0, 0)),                # W_in
            pl.BlockSpec((1, hp), lambda l, i: (0, 0)),                 # b_in
            pl.BlockSpec((None, hp, hp),                                # W_layer l-1
                         lambda l, i: (jnp.maximum(l - 1, 0), 0, 0)),
            pl.BlockSpec((hp, op), lambda l, i: (0, 0)),                # W_out
            pl.BlockSpec((1, op), lambda l, i: (0, 0)),                 # b_out
        ],
        # Output tiles exist only at l == num_layers: keep the block index
        # frozen before that, so no uninitialized VMEM is ever written back.
        out_specs=pl.BlockSpec(
            (tm, op), lambda l, i: (jnp.where(l == num_layers, i, 0), 0)),
        scratch_shapes=[
            pltpu.VMEM((np_, hp), jnp.bfloat16),       # h0 residual (bf16)
            pltpu.VMEM((2, np_, hp), jnp.bfloat16),    # h ping-pong buffers
        ],
        compiler_params=pltpu.CompilerParams(
            # Both axes must stay "arbitrary": layer l reads ALL row tiles of
            # layer l-1 from the resident hbuf scratch, so neither axis can be
            # split across megacore TensorCores.
            # TODO(synk): on v7x, use pl.core_map over a 2-TC mesh with
            # VMEM_SHARED activations + pltpu.core_barrier per layer to engage
            # both TensorCores.
            dimension_semantics=("arbitrary", "arbitrary"),
            vmem_limit_bytes=vmem_limit),
    )(betas, a_hat, x_p, w_in, b_in, w_layers, w_out, b_out)

    return out[:n, :o]


# ----------------------------------------------------------------------------
# Pure-JAX f32 reference for validation
# ----------------------------------------------------------------------------
def gcn2net_reference(x, edge_index, edge_weight, params, *,
                      num_layers, alpha, theta):
    n = x.shape[0]
    a_hat = gcn_norm_dense(edge_index, edge_weight, n)
    h0 = x @ params["w_in"] + params["b_in"]
    h = h0
    for l in range(num_layers):
        beta = math.log(theta / (l + 1) + 1.0)
        agg = a_hat @ h
        mix = (1.0 - alpha) * agg + alpha * h0
        out = (1.0 - beta) * mix + beta * (mix @ params["w_layers"][l])
        h = jnp.maximum(out, 0.0)
    return h @ params["w_out"] + params["b_out"]


# ----------------------------------------------------------------------------
# Deterministic parameter init (synthetic — no checkpoint load)
# ----------------------------------------------------------------------------
def init_params(key, input_size, hidden_size, output_size, num_layers):
    ks = jax.random.split(key, 5)

    def glorot(k, shape):
        limit = math.sqrt(6.0 / (shape[-2] + shape[-1]))
        return jax.random.uniform(k, shape, jnp.float32, -limit, limit)

    return {
        "w_in": glorot(ks[0], (input_size, hidden_size)),
        "b_in": 0.01 * jax.random.normal(ks[1], (1, hidden_size), jnp.float32),
        "w_layers": glorot(ks[2], (num_layers, hidden_size, hidden_size)),
        "w_out": glorot(ks[3], (hidden_size, output_size)),
        "b_out": 0.01 * jax.random.normal(ks[4], (1, output_size), jnp.float32),
    }


if __name__ == "__main__":
    # Small, module-consistent shapes.
    num_nodes = 16
    input_size = 8
    hidden_size = 32
    output_size = 8
    num_layers = 3
    alpha = 0.1
    theta = 0.5

    key = jax.random.PRNGKey(0)
    k_x, k_w, k_p = jax.random.split(key, 3)

    # Node features.
    x = jax.random.normal(k_x, (num_nodes, input_size), jnp.float32)

    # Ring graph, both directions, no self loops.
    src = jnp.arange(num_nodes, dtype=jnp.int32)
    dst = (src + 1) % num_nodes
    edge_index = jnp.concatenate(
        [jnp.stack([src, dst]), jnp.stack([dst, src])], axis=1)  # [2, 2N]
    edge_weight = jax.random.uniform(
        k_w, (edge_index.shape[1],), jnp.float32, 0.5, 1.5)

    params = init_params(k_p, input_size, hidden_size, output_size, num_layers)

    out = gcn2net_forward(x, edge_index, edge_weight, params,
                          num_layers=num_layers, alpha=alpha, theta=theta)
    out = jax.block_until_ready(out)

    ref = gcn2net_reference(x, edge_index, edge_weight, params,
                            num_layers=num_layers, alpha=alpha, theta=theta)
    assert out.shape == (num_nodes, output_size)
    # bf16 MXU operands (f32 accumulation) -> loose-but-meaningful tolerance
    # vs the pure-f32 reference.
    assert jnp.allclose(out, ref, rtol=5e-2, atol=5e-2), "mismatch vs reference"

    print("KERNEL_OK")
</pallas_src>

<mosaic_0001>
module attributes {stable_mosaic.version = 11 : i64} {
  func.func @kernel(%arg0: i32, %arg1: i32, %arg2: memref<3xf32, #tpu.memory_space<smem>>, %arg3: memref<16x16xbf16, #tpu.memory_space<vmem>>, %arg4: memref<16x128xbf16, #tpu.memory_space<vmem>>, %arg5: memref<128x128xbf16, #tpu.memory_space<vmem>>, %arg6: memref<1x128xf32, #tpu.memory_space<vmem>>, %arg7: memref<1x128x128xbf16, #tpu.memory_space<vmem>>, %arg8: memref<128x128xbf16, #tpu.memory_space<vmem>>, %arg9: memref<1x128xf32, #tpu.memory_space<vmem>>, %arg10: memref<16x128xf32, #tpu.memory_space<vmem>>, %arg11: memref<16x128xbf16, #tpu.memory_space<vmem>>, %arg12: memref<2x16x128xbf16, #tpu.memory_space<vmem>>) attributes {dimension_semantics = [#tpu.dimension_semantics<arbitrary>, #tpu.dimension_semantics<arbitrary>], iteration_bounds = array<i64: 4, 1>, scalar_prefetch = 0 : i64, scratch_operands = 2 : i64, tpu.core_type = #tpu.core_type<tc>, window_params = [{transform_indices = @transform_0, window_bounds = array<i64: 3>}, {pipeline_mode = #tpu.pipeline_mode<synchronous>, transform_indices = @transform_1, window_bounds = array<i64: 16, 16>}, {transform_indices = @transform_2, window_bounds = array<i64: 16, 128>}, {pipeline_mode = #tpu.pipeline_mode<synchronous>, transform_indices = @transform_3, window_bounds = array<i64: 128, 128>}, {pipeline_mode = #tpu.pipeline_mode<synchronous>, transform_indices = @transform_4, window_bounds = array<i64: 1, 128>}, {transform_indices = @transform_5, window_bounds = array<i64: 1, 128, 128>}, {pipeline_mode = #tpu.pipeline_mode<synchronous>, transform_indices = @transform_6, window_bounds = array<i64: 128, 128>}, {pipeline_mode = #tpu.pipeline_mode<synchronous>, transform_indices = @transform_7, window_bounds = array<i64: 1, 128>}, {transform_indices = @transform_8, window_bounds = array<i64: 16, 128>}]} {
    %c16_i32 = arith.constant 16 : i32
    %0 = arith.muli %arg1, %c16_i32 : i32
    %1 = tpu.assume_multiple %0, 16 : i32
    %c0_i32 = arith.constant 0 : i32
    %2 = arith.cmpi eq, %arg0, %c0_i32 : i32
    %3 = arith.extui %2 : i1 to i32
    %c0_i32_0 = arith.constant 0 : i32
    %4 = arith.cmpi ne, %3, %c0_i32_0 : i32
    scf.if %4 {
      %c0 = arith.constant 0 : index
      %c0_3 = arith.constant 0 : index
      %8 = vector.load %arg4[%c0, %c0_3] : memref<16x128xbf16, #tpu.memory_space<vmem>>, vector<16x128xbf16>
      %c0_4 = arith.constant 0 : index
      %c0_5 = arith.constant 0 : index
      %9 = vector.load %arg5[%c0_4, %c0_5] : memref<128x128xbf16, #tpu.memory_space<vmem>>, vector<128x128xbf16>
      %cst = arith.constant dense<0.000000e+00> : vector<16x128xf32>
      %10 = tpu.matmul %8, %9, %cst {dimension_numbers = #tpu.dot_dimension_numbers<[1], [0], [0], [1], [0, 0, 1, 1], [], []>} : vector<16x128xbf16>, vector<128x128xbf16>, vector<16x128xf32> -> vector<16x128xf32>
      %c0_6 = arith.constant 0 : index
      %c0_7 = arith.constant 0 : index
      %11 = vector.load %arg6[%c0_6, %c0_7] : memref<1x128xf32, #tpu.memory_space<vmem>>, vector<1x128xf32>
      %12 = vector.broadcast %11 : vector<1x128xf32> to vector<16x128xf32>
      %13 = arith.addf %10, %12 : vector<16x128xf32>
      %14 = arith.truncf %13 : vector<16x128xf32> to vector<16x128xbf16>
      %15 = arith.index_cast %1 : i32 to index
      %c0_8 = arith.constant 0 : index
      %16 = vector.load %arg11[%15, %c0_8] : memref<16x128xbf16, #tpu.memory_space<vmem>>, vector<16x128xbf16>
      tpu.vector_store %arg11[%15, %c0_8], %14 {strides = array<i32>} : memref<16x128xbf16, #tpu.memory_space<vmem>>, vector<16x128xbf16>,
      %c0_9 = arith.constant 0 : index
      %17 = arith.index_cast %1 : i32 to index
      %c0_10 = arith.constant 0 : index
      %18 = vector.load %arg12[%c0_9, %17, %c0_10] : memref<2x16x128xbf16, #tpu.memory_space<vmem>>, vector<1x16x128xbf16>
      %19 = vector.shape_cast %18 : vector<1x16x128xbf16> to vector<16x128xbf16>
      %20 = vector.shape_cast %14 : vector<16x128xbf16> to vector<1x16x128xbf16>
      tpu.vector_store %arg12[%c0_9, %17, %c0_10], %20 {strides = array<i32>} : memref<2x16x128xbf16, #tpu.memory_space<vmem>>, vector<1x16x128xbf16>,
    } else {
    }
    %c0_i32_1 = arith.constant 0 : i32
    %5 = arith.cmpi sgt, %arg0, %c0_i32_1 : i32
    %6 = arith.extui %5 : i1 to i32
    %c0_i32_2 = arith.constant 0 : i32
    %7 = arith.cmpi ne, %6, %c0_i32_2 : i32
    scf.if %7 {
      %c1_i32 = arith.constant 1 : i32
      %8 = arith.subi %arg0, %c1_i32 : i32
      %9 = arith.index_cast %8 : i32 to index
      %10 = memref.load %arg2[%9] : memref<3xf32, #tpu.memory_space<smem>>
      %c2_i32 = arith.constant 2 : i32
      %11 = arith.remsi %8, %c2_i32 : i32
      %c1_i32_3 = arith.constant 1 : i32
      %12 = arith.subi %c1_i32_3, %11 : i32
      %13 = arith.index_cast %11 : i32 to index
      %c0 = arith.constant 0 : index
      %c0_4 = arith.constant 0 : index
      %14 = vector.load %arg12[%13, %c0, %c0_4] : memref<2x16x128xbf16, #tpu.memory_space<vmem>>, vector<1x16x128xbf16>
      %15 = vector.shape_cast %14 : vector<1x16x128xbf16> to vector<16x128xbf16>
      %16 = arith.index_cast %1 : i32 to index
      %c0_5 = arith.constant 0 : index
      %17 = vector.load %arg3[%16, %c0_5] : memref<16x16xbf16, #tpu.memory_space<vmem>>, vector<16x16xbf16>
      %cst = arith.constant dense<0.000000e+00> : vector<16x128xf32>
      %18 = tpu.matmul %17, %15, %cst {dimension_numbers = #tpu.dot_dimension_numbers<[1], [0], [0], [1], [0, 0, 1, 1], [], []>} : vector<16x16xbf16>, vector<16x128xbf16>, vector<16x128xf32> -> vector<16x128xf32>
      %cst_6 = arith.constant 0.899999976 : f32
      %19 = vector.broadcast %cst_6 : f32 to vector<16x128xf32>
      %20 = arith.mulf %19, %18 : vector<16x128xf32>
      %21 = arith.index_cast %1 : i32 to index
      %c0_7 = arith.constant 0 : index
      %22 = vector.load %arg11[%21, %c0_7] : memref<16x128xbf16, #tpu.memory_space<vmem>>, vector<16x128xbf16>
      %23 = arith.extf %22 : vector<16x128xbf16> to vector<16x128xf32>
      %cst_8 = arith.constant 1.000000e-01 : f32
      %24 = vector.broadcast %cst_8 : f32 to vector<16x128xf32>
      %25 = arith.mulf %24, %23 : vector<16x128xf32>
      %26 = arith.addf %20, %25 : vector<16x128xf32>
      %cst_9 = arith.constant 1.000000e+00 : f32
      %27 = arith.subf %cst_9, %10 : f32
      %28 = vector.broadcast %27 : f32 to vector<16x128xf32>
      %29 = arith.mulf %28, %26 : vector<16x128xf32>
      %30 = arith.truncf %26 : vector<16x128xf32> to vector<16x128xbf16>
      %c0_10 = arith.constant 0 : index
      %c0_11 = arith.constant 0 : index
      %c0_12 = arith.constant 0 : index
      %31 = vector.load %arg7[%c0_10, %c0_11, %c0_12] : memref<1x128x128xbf16, #tpu.memory_space<vmem>>, vector<1x128x128xbf16>
      %32 = vector.shape_cast %31 : vector<1x128x128xbf16> to vector<128x128xbf16>
      %cst_13 = arith.constant dense<0.000000e+00> : vector<16x128xf32>
      %33 = tpu.matmul %30, %32, %cst_13 {dimension_numbers = #tpu.dot_dimension_numbers<[1], [0], [0], [1], [0, 0, 1, 1], [], []>} : vector<16x128xbf16>, vector<128x128xbf16>, vector<16x128xf32> -> vector<16x128xf32>
      %34 = vector.broadcast %10 : f32 to vector<16x128xf32>
      %35 = arith.mulf %34, %33 : vector<16x128xf32>
      %36 = arith.addf %29, %35 : vector<16x128xf32>
      %cst_14 = arith.constant 0.000000e+00 : f32
      %37 = vector.broadcast %cst_14 : f32 to vector<16x128xf32>
      %38 = arith.maximumf %36, %37 : vector<16x128xf32>
      %c3_i32 = arith.constant 3 : i32
      %39 = arith.cmpi slt, %arg0, %c3_i32 : i32
      %40 = arith.extui %39 : i1 to i32
      %c0_i32_15 = arith.constant 0 : i32
      %41 = arith.cmpi ne, %40, %c0_i32_15 : i32
      scf.if %41 {
        %45 = arith.truncf %38 : vector<16x128xf32> to vector<16x128xbf16>
        %46 = arith.index_cast %12 : i32 to index
        %47 = arith.index_cast %1 : i32 to index
        %c0_18 = arith.constant 0 : index
        %48 = vector.load %arg12[%46, %47, %c0_18] : memref<2x16x128xbf16, #tpu.memory_space<vmem>>, vector<1x16x128xbf16>
        %49 = vector.shape_cast %48 : vector<1x16x128xbf16> to vector<16x128xbf16>
        %50 = vector.shape_cast %45 : vector<16x128xbf16> to vector<1x16x128xbf16>
        tpu.vector_store %arg12[%46, %47, %c0_18], %50 {strides = array<i32>} : memref<2x16x128xbf16, #tpu.memory_space<vmem>>, vector<1x16x128xbf16>,
      } else {
      }
      %c3_i32_16 = arith.constant 3 : i32
      %42 = arith.cmpi eq, %arg0, %c3_i32_16 : i32
      %43 = arith.extui %42 : i1 to i32
      %c0_i32_17 = arith.constant 0 : i32
      %44 = arith.cmpi ne, %43, %c0_i32_17 : i32
      scf.if %44 {
        %45 = arith.truncf %38 : vector<16x128xf32> to vector<16x128xbf16>
        %c0_18 = arith.constant 0 : index
        %c0_19 = arith.constant 0 : index
        %46 = vector.load %arg8[%c0_18, %c0_19] : memref<128x128xbf16, #tpu.memory_space<vmem>>, vector<128x128xbf16>
        %cst_20 = arith.constant dense<0.000000e+00> : vector<16x128xf32>
        %47 = tpu.matmul %45, %46, %cst_20 {dimension_numbers = #tpu.dot_dimension_numbers<[1], [0], [0], [1], [0, 0, 1, 1], [], []>} : vector<16x128xbf16>, vector<128x128xbf16>, vector<16x128xf32> -> vector<16x128xf32>
        %c0_21 = arith.constant 0 : index
        %c0_22 = arith.constant 0 : index
        %48 = vector.load %arg9[%c0_21, %c0_22] : memref<1x128xf32, #tpu.memory_space<vmem>>, vector<1x128xf32>
        %49 = vector.broadcast %48 : vector<1x128xf32> to vector<16x128xf32>
        %50 = arith.addf %47, %49 : vector<16x128xf32>
        %c0_23 = arith.constant 0 : index
        %c0_24 = arith.constant 0 : index
        %51 = vector.load %arg10[%c0_23, %c0_24] : memref<16x128xf32, #tpu.memory_space<vmem>>, vector<16x128xf32>
        tpu.vector_store %arg10[%c0_23, %c0_24], %50 {strides = array<i32>} : memref<16x128xf32, #tpu.memory_space<vmem>>, vector<16x128xf32>,
      } else {
      }
    } else {
    }
    return
  }
  func.func @transform_0(%arg0: i32, %arg1: i32) -> i32 {
    %c0_i32 = arith.constant 0 : i32
    %c0_i32_0 = arith.constant 0 : i32
    return %c0_i32 : i32
  }
  func.func @transform_1(%arg0: i32, %arg1: i32) -> (i32, i32) {
    %c0_i32 = arith.constant 0 : i32
    %c0_i32_0 = arith.constant 0 : i32
    %c0_i32_1 = arith.constant 0 : i32
    return %c0_i32, %c0_i32_0 : i32, i32
  }
  func.func @transform_2(%arg0: i32, %arg1: i32) -> (i32, i32) {
    %c0_i32 = arith.constant 0 : i32
    %0 = arith.cmpi eq, %arg0, %c0_i32 : i32
    %c0_i32_0 = arith.constant 0 : i32
    %1 = arith.select %0, %arg1, %c0_i32_0 : i32
    %c0_i32_1 = arith.constant 0 : i32
    %c0_i32_2 = arith.constant 0 : i32
    return %1, %c0_i32_1 : i32, i32
  }
  func.func @transform_3(%arg0: i32, %arg1: i32) -> (i32, i32) {
    %c0_i32 = arith.constant 0 : i32
    %c0_i32_0 = arith.constant 0 : i32
    %c0_i32_1 = arith.constant 0 : i32
    return %c0_i32, %c0_i32_0 : i32, i32
  }
  func.func @transform_4(%arg0: i32, %arg1: i32) -> (i32, i32) {
    %c0_i32 = arith.constant 0 : i32
    %c0_i32_0 = arith.constant 0 : i32
    %c0_i32_1 = arith.constant 0 : i32
    return %c0_i32, %c0_i32_0 : i32, i32
  }
  func.func @transform_5(%arg0: i32, %arg1: i32) -> (i32, i32, i32) {
    %c1_i32 = arith.constant 1 : i32
    %0 = arith.subi %arg0, %c1_i32 : i32
    %c0_i32 = arith.constant 0 : i32
    %1 = arith.maxsi %0, %c0_i32 : i32
    %c0_i32_0 = arith.constant 0 : i32
    %c0_i32_1 = arith.constant 0 : i32
    %c0_i32_2 = arith.constant 0 : i32
    return %1, %c0_i32_0, %c0_i32_1 : i32, i32, i32
  }
  func.func @transform_6(%arg0: i32, %arg1: i32) -> (i32, i32) {
    %c0_i32 = arith.constant 0 : i32
    %c0_i32_0 = arith.constant 0 : i32
    %c0_i32_1 = arith.constant 0 : i32
    return %c0_i32, %c0_i32_0 : i32, i32
  }
  func.func @transform_7(%arg0: i32, %arg1: i32) -> (i32, i32) {
    %c0_i32 = arith.constant 0 : i32
    %c0_i32_0 = arith.constant 0 : i32
    %c0_i32_1 = arith.constant 0 : i32
    return %c0_i32, %c0_i32_0 : i32, i32
  }
  func.func @transform_8(%arg0: i32, %arg1: i32) -> (i32, i32) {
    %c3_i32 = arith.constant 3 : i32
    %0 = arith.cmpi eq, %arg0, %c3_i32 : i32
    %c0_i32 = arith.constant 0 : i32
    %1 = arith.select %0, %arg1, %c0_i32 : i32
    %c0_i32_0 = arith.constant 0 : i32
    %c0_i32_1 = arith.constant 0 : i32
    return %1, %c0_i32_0 : i32, i32
  }
}

</mosaic_0001>

<bundles_post_ra>
// kernel: tpu_custom_call.1
= control target key start
LH: loop header
LB: loop body
LE: loop exit
PB: predicated region body
PF: predicated region fallthrough
CT: control target
= control target key end

     0   :  { %s1869_s0 = inlined_call_operand.hbm [shape: f32[3], index: 0, kind: input, shape index: {}]   ;;  %s1870_s1 = inlined_call_operand.hbm [shape: bf16[16,16], index: 1, kind: input, shape index: {}]   ;;  %s1871_s2 = inlined_call_operand.hbm [shape: bf16[16,128], index: 2, kind: input, shape index: {}]   ;;  %s1872_s3 = inlined_call_operand.hbm [shape: bf16[128,128], index: 3, kind: input, shape index: {}]   ;;  %s1873_s4 = inlined_call_operand.vmem [shape: f32[1,128], index: 4, kind: input, shape index: {}]   ;;  %s1874_s5 = inlined_call_operand.hbm [shape: bf16[3,128,128], index: 5, kind: input, shape index: {}]   ;;  %s1875_s6 = inlined_call_operand.hbm [shape: bf16[128,128], index: 6, kind: input, shape index: {}]   ;;  %s1876_s7 = inlined_call_operand.vmem [shape: f32[1,128], index: 7, kind: input, shape index: {}]   ;;  %s1877_s8 = inlined_call_operand.hbm [shape: f32[16,128], index: 8, kind: output, shape index: {}]  }
   0x1   :  { %1881 = sst [smem:[#allocation23_spill]] %s1869_s0 }
   0x2   :  { %1882 = sst [smem:[#allocation24_spill]] %s1870_s1 }
   0x3   :  { %1883 = sst [smem:[#allocation25_spill]] %s1871_s2 }
   0x4   :  { %1884 = sst [smem:[#allocation26_spill]] %s1872_s3 }
   0x5   :  { %1885 = sst [smem:[#allocation27_spill]] %s1875_s6 }
   0x6   :  { %13 = vsyncpa [#allocation7], 0 }
   0x7   :  { %14 = vsyncpa [#allocation5], 0 }
   0x8   :  { %15 = vsyncpa [#allocation10], 0 }
   0x9   :  { %17 = vsyncpa [#allocation10 + $0x1], 0 }
   0xa   :  { %18 = vsyncpa [#allocation13], 0 }
   0xb   :  { %20 = vsyncpa [#allocation13 + $0x1], 0 }
   0xc   :  { %21 = vsyncpa [#allocation6], 0 }
   0xd   :  { %23 = vsyncpa [#allocation6 + $0x1], 0  ;;  %s1655_s27 = smov 0   ;;  %s1657_s28 = smov 0  }
   0xe   :  { %s1659_s29 = smov 0   ;;  %s1661_s30 = smov 0  }
   0xf   :  { %s1663_s9 = smov 0   ;;  %s1665_s10 = smov 0  }
  0x10 LB: > { %s1684_s11 = sadd.s32 4294967295, %s1598_s10   ;;  %p181_p0 = scmp.ne.s32.totalorder %s1582_s28, %s1578_s27  ;;  %s1598_s10 = sphi %s1665_s10, %s29_s10   ;;  %s1594_s9 = sphi %s1663_s9, %s1903_s9   ;;  %s1590_s30 = sphi %s1661_s30, %s1902_s30   ;;  %s1586_s29 = sphi %s1659_s29, %s1901_s29   ;;  %s1582_s28 = sphi %s1657_s28, %s1900_s28   ;;  %s1578_s27 = sphi %s1655_s27, %s1899_s27  }
  0x11   : > { %p182_p1 = scmp.eq.s32.totalorder %s1684_s11, 0  ;;  %p1017_p2 = scmp.ge.s32.totalorder %s1598_s10, 1 }
  0x12   : > { %p264_p3 = scmp.lt.s32.totalorder %s1598_s10, 5  ;;  %s1888_s3 = sld [smem:[#allocation26_spill]] }
  0x13   : > { %p1693_p4 = por %p182_p1, %p181_p0  ;;  %s1600_s19 = smov [#allocation11]  }
  0x14   : > { %p1697_p5 = pnand %p1017_p2, %p264_p3  ;;  %s301_s20 = sshll.u32 %s1600_s19, 4  ;;  %s302_s20 = int_to_ptr.vmem [resolvable:$true] %s301_s20 }
  0x15   : > { %s1890_s6 = sld [smem:[#allocation27_spill]]  ;;  %s1878_s24 = smov 64  }
  0x16   : > { %p1233_p6 = pneg %p1697_p5  ;;  %s1879_s25 = smov 4  }
  0x17   : > { %s1603_s26 = smov [#allocation14]   ;;  %s1891_s0 = sld [smem:[#allocation23_spill]] }
  0x18   : > { %s299_s17 = sshll.u32 %s1888_s3, 4  ;;  %p1708_p7 = pnand %p1233_p6, %p182_p1  ;;  %s300_s17 = int_to_ptr.hbm [resolvable:$true] %s299_s17 }
  0x19   : > { %s318_s27 = sshll.u32 %s1603_s26, 4  ;;  %s1892_s1 = sld [smem:[#allocation24_spill]]  ;;  %s319_s27 = int_to_ptr.vmem [resolvable:$true] %s318_s27 }
  0x1a   : > { %1242 = dma.hbm_to_vmem [thread:$0]  (!%p1708_p7), %s300_s17, 1024, %s302_s20, [#allocation10], %s1878_s24, %s1878_s24, %s1879_s25  }
  0x1b   : > { %s316_s23 = sshll.u32 %s1890_s6, 4  ;;  %s1604_s22 = smov [#allocation4]   ;;  %s317_s23 = int_to_ptr.hbm [resolvable:$true] %s316_s23 }
  0x1c   : > { %1245 = dma.hbm_to_vmem [thread:$0]  (!%p1708_p7), %s317_s23, 1024, %s319_s27, [#allocation13], %s1878_s24, %s1878_s24, %s1879_s25  }
  0x1d   : > { %s276_s19 = sshll.u32 %s1891_s0, 4  ;;  %s1605_s26 = smov [#allocation8]   ;;  %s277_s19 = int_to_ptr.hbm [resolvable:$true] %s276_s19 }
  0x1e   : > { %1236 = dma.hbm_to_smem (!%p1708_p7), %s277_s19, 16, %s1604_s22, [#allocation7]  }
  0x1f   : > { %s285_s21 = sshll.u32 %s1892_s1, 4  ;;  %s287_s23 = sshll.u32 %s1605_s26, 4  ;;  %s286_s21 = int_to_ptr.hbm [resolvable:$true] %s285_s21  ;;  %s288_s23 = int_to_ptr.vmem [resolvable:$true] %s287_s23 }
  0x20   : > { %p176_p8 = scmp.eq.s32.totalorder %s1598_s10, 0  ;;  %p1261_p9 = scmp.lt.s32.totalorder %s1598_s10, 4 }
  0x21   : > { %1239 = dma.hbm_to_vmem [thread:$0]  (!%p1708_p7), %s286_s21, 128, %s288_s23, [#allocation5], %s1878_s24, %s1878_s24, %s1879_s25  }
  0x22   : > { %s1880_s27 = sand.u32 1, %s1598_s10   ;;  %s1893_s2 = sld [smem:[#allocation25_spill]] }
  0x23   : > { %p1247_p10 = pnand %p1261_p9, %p176_p8  ;;  %s1606_s17 = smov [#allocation9]  }
  0x24   : > { %s349_s20 = sshll.u32 %s1606_s17, 4  ;;  %s336_s18 = scalar_lea.sflag [#allocation10], %s1880_s27  ;;  %s350_s20 = int_to_ptr.vmem [resolvable:$true] %s349_s20 }
  0x25   : > { %s168_s21 = sadd.s32 1, %s1586_s29  ;;  %s41_s22 = sadd.s32 1, %s1594_s9 }
  0x26   : > { %s1015_s26 = sadd.s32 4294967295, %s1594_s9  ;;  %p43_p11 = scmp.ge.s32.totalorder %s41_s22, 4 }
  0x27   : > { %p160_p12 = scmp.gt.s32.totalorder %s1015_s26, 0  ;;  %p175_p13 = scmp.ne.s32.totalorder %s1586_s29, %s1582_s28 }
  0x28   : > { %s347_s19 = sshll.u32 %s1893_s2, 4  ;;  %s1905_s22 = smov (%p43_p11, %s41_s22), 0  ;;  %s348_s19 = int_to_ptr.hbm [resolvable:$true] %s347_s19 }
  0x29   : > { %1249 = dma.hbm_to_vmem [thread:$0]  (!%p1247_p10), %s348_s19, 128, %s350_s20, %s336_s18, %s1878_s24, %s1878_s24, %s1879_s25  }
  0x2a   : > { %s1907_s26 = smov (!%p160_p12, %s1015_s26), 0  ;;  %s1016_s23 = sadd.s32 4294967295, %s1905_s22 }
  0x2b   : > { %p1763_p0 = por %p176_p8, %p175_p13  ;;  %p163_p2 = scmp.gt.s32.totalorder %s1016_s23, 0 }
  0x2c   : > { %s361_s16 = sand.u32 1, %s1586_s29   ;;  %s1158_s17 = sshll.u32 %s1907_s26, 6 }
  0x2d   : > { %s1024_s19 = sshll.u32 %s361_s16, 6  ;;  %s1909_s23 = smov (!%p163_p2, %s1016_s23), 0 }
  0x2e   : > { %s371_s12 = scalar_lea.hbm %s1874_s5, %s1158_s17  ;;  %s165_s24 = ssub.s32 %s1907_s26, %s1909_s23 }
  0x2f   : > { %s372_s25 = sshll.u32 %s371_s12, 4  ;;  %p166_p3 = scmp.eq.s32.totalorder %s165_s24, 0  ;;  %s373_s25 = int_to_ptr.hbm [resolvable:$true] %s372_s25 }
  0x30   : > { %s363_s27 = scalar_lea.vmem [#allocation12], %s1024_s19  ;;  %p1250_p6 = pnand %p1261_p9, %p1763_p0 }
  0x31   : > { %s374_s0 = sshll.u32 %s363_s27, 4  ;;  %s1895_s2 = sand.u32 1, %s1598_s10   ;;  %s375_s0 = int_to_ptr.vmem [resolvable:$true] %s374_s0 }
  0x32   : > { %s1776_s1 = scalar_select %p166_p3, %s1586_s29, %s168_s21  }
  0x33   : > { %s360_s16 = scalar_lea.sflag [#allocation13], %s1895_s2  ;;  %s1896_s3 = smov 4  }
  0x34   : > { %s1897_s6 = smov 64   ;;  %386 = sbr.rel (%p1697_p5) target bundleno = 729 (0x2d9), region = 52 }
  0x35   : > { %1252 = dma.hbm_to_vmem [thread:$0]  (!%p1250_p6), %s373_s25, 1024, %s375_s0, %s360_s16, %s1897_s6, %s1897_s6, %s1896_s3  }
  0x39   : > { %1549 = dma.done.wait (%p182_p1), [#allocation7], 16  }
  0x3a   : > { %1551 = vsyncadd (%p182_p1), [#allocation7], 4294967280 }
  0x3b   : > { %1553 = dma.done.wait (%p182_p1), [#allocation5], 128  }
  0x3c   : > { %1555 = vsyncadd (%p182_p1), [#allocation5], 4294967168  ;;  %s398_s2 = sand.u32 1, %s1684_s11  }
  0x3d   : > { %s399_s12 = scalar_lea.sflag [#allocation10], %s398_s2 }
  0x3e   : > { %1557 = dma.done.wait (%p182_p1), %s399_s12, 128  }
  0x3f   : > { %1559 = vsyncadd (%p182_p1), %s399_s12, 4294967168 }
  0x40   : > { %1561 = dma.done.wait (%p182_p1), [#allocation10], 1024  }
  0x41   : > { %1563 = vsyncadd (%p182_p1), [#allocation10], 4294966272  ;;  %s415_s0 = sand.u32 1, %s1582_s28   ;;  %s414_s6 = scalar_lea.sflag [#allocation13], %s398_s2 }
  0x42   : > { %s1033_s3 = sshll.u32 %s415_s0, 6 }
  0x43   : > { %s1803_s14 = scalar_lea.vmem [#allocation12], %s1033_s3 }
  0x44   : > { %1565 = dma.done.wait (%p1693_p4), %s414_s6, 1024  }
  0x45   : > { %1567 = vsyncadd (%p1693_p4), %s414_s6, 4294966272 }
  0x46   : > { %1569 = dma.done.wait (%p182_p1), [#allocation13], 1024  }
  0x47   : > { %1571 = vsyncadd (%p182_p1), [#allocation13], 4294966272 }
  0x48   : > { %428 = sfence }
  0x49   : > { %p1035_p5 = scmp.ne.s32.totalorder %s1590_s30, 0 }
  0x4b   : > { %476 = sbr.rel (%p1035_p5) target bundleno = 252 (0xfc), region = 80 }
  0x50   : > { %v1167_v0 = vld [vmem:[#allocation11 + $0x38] sm:$0xff]  ;;  %v1166_v1 = vld [vmem:[#allocation11 + $0x30] sm:$0xff]  ;;  %v1165_v2 = vld [vmem:[#allocation11 + $0x28] sm:$0xff] }
  0x51   : > { %553 = vmatpush.bf16.msra.mxu0 %v1167_v0  ;;  %v1164_v3 = vld [vmem:[#allocation11 + $0x20] sm:$0xff]  ;;  %v1163_v4 = vld [vmem:[#allocation11 + $0x18] sm:$0xff]  ;;  %v1162_v5 = vld [vmem:[#allocation11 + $0x10] sm:$0xff] }
  0x52   : > { %v1161_v6 = vld [vmem:[#allocation11 + $0x8] sm:$0xff]  ;;  %v1160_v7 = vld [vmem:[#allocation11] sm:$0xff]  ;;  %v1159_v8 = vld [vmem:[#allocation9] sm:$0xff] }
  0x53   : > { %v1329_v10 = vld [vmem:[%s1873_s4] ss:$0 sm:$0xff] }
  0x55   : > { %554 = vmatpush.bf16.msra.mxu0 %v1166_v1 }
  0x59   : > { %555 = vmatpush.bf16.msra.mxu0 %v1165_v2 }
  0x5d   : > { %556 = vmatpush.bf16.msra.mxu0 %v1164_v3 }
  0x61   : > { %557 = vmatpush.bf16.msra.mxu0 %v1163_v4 }
  0x65   : > { %558 = vmatpush.bf16.msra.mxu0 %v1162_v5 }
  0x69   : > { %559 = vmatpush.bf16.msra.mxu0 %v1161_v6 }
  0x6d   : > { %560 = vmatpush.bf16.msra.mxu0 %v1160_v7 }
  0x70   : > { %561 = vmatmul.bf16.vlgmr.msra.gmra.mxu0 %v1159_v8 }
  0xed   : > { %v562_v9 = vpop.f32.mrf.mxu0 }
  0xee   : > { %v563_v12 = vadd.f32 %v1329_v10, %v562_v9 }
  0xf5   : > { %v564_v11 = vpop.f32.mrf.mxu0 }
  0xf6   : > { %v565_v13 = vadd.f32 %v1329_v10, %v564_v11 }
  0xf8   : > { %v1191_v14 = vpack.c.bf16 %v565_v13, %v563_v12 }
  0xfa   : > { %1192 = vst [vmem:[#allocation2] sm:$0xff] %v1191_v14  }
  0xfb   : > { %1197 = vst [vmem:[#allocation3] sm:$0xff] %v1191_v14  }
  0xfc PF: > { %p1072_p1 = scmp.le.s32.totalorder %s1590_s30, 0 }
  0xfd   : > { %s1819_s25 = sadd.s32 (!%p1072_p1), 4294967295, %s1590_s30  ;;  %p1118_p7 = scmp.ge.s32.totalorder (!%p1072_p1), %s1590_s30, 3 }
  0xfe   : > { %582 = sbr.rel (%p1072_p1) target bundleno = 725 (0x2d5), region = 84  ;;  %p585_p4 = scmp.lt.s32.totalorder (!%p1072_p1), %s1819_s25, 0 }
  0xff   : > { %s586_s27 = ssub.s32 (!%p1072_p1), 0, %s1819_s25  ;;  %s584_s20 = sld [smem:[#allocation4 + %s1819_s25]] (!%p1072_p1) }
 0x100   : > { %s1074_s21 = smin.u32 (!%p1072_p1), %s1819_s25, %s586_s27 }
 0x101   : > { %s588_s26 = sand.u32 (!%p1072_p1), 1, %s1074_s21  }
 0x102   : > { %s589_s23 = ssub.s32 (!%p1072_p1), 0, %s588_s26 }
 0x103   : > { %v1178_v15 = vld [vmem:[%s1803_s14 + $0x38] sm:$0xff]  ;;  %v1177_v16 = vld [vmem:[%s1803_s14 + $0x30] sm:$0xff]  ;;  %s1911_s23 = smov (!%p585_p4, %s589_s23), %s588_s26  ;;  %v1176_v17 = vld [vmem:[%s1803_s14 + $0x28] sm:$0xff]  ;;  %vm614_vm0 = vcmask 130048  }
 0x104   : > { %713 = vmatpush.bf16.msra.mxu1 %v1178_v15  ;;  %s591_s15 = ssub.s32 1, %s1911_s23  ;;  %s1168_s19 = sshll.u32 %s1911_s23, 3  ;;  %v1170_v19 = vld [vmem:[#allocation8] sm:$0xff]  ;;  %v1175_v20 = vld [vmem:[%s1803_s14 + $0x20] sm:$0xff]  ;;  %v1174_v21 = vld [vmem:[%s1803_s14 + $0x18] sm:$0xff] }
 0x105   : > { %s594_s17 = scalar_lea.vmem [#allocation3], %s1168_s19  ;;  %v1173_v22 = vld [vmem:[%s1803_s14 + $0x10] sm:$0xff]  ;;  %v1172_v23 = vld [vmem:[%s1803_s14 + $0x8] sm:$0xff]  ;;  %v1171_v24 = vld [vmem:[%s1803_s14] sm:$0xff]  ;;  %s644_s18 = ssub.f32 1.0, %s584_s20  ;;  %v727_v40 = vstv %s584_s20 }
 0x106   : > { %v1169_v18 = vld [vmem:[%s594_s17] sm:$0xff]  ;;  %s1179_s16 = sshll.u32 (!%p1118_p7), %s591_s15, 3 }
 0x107   : > { %625 = vmatpush.bf16.msra.mxu0 %v1169_v18  ;;  %v1199_v25 = vld [vmem:[#allocation2] sm:$0xff]   ;;  %v645_v30 = vstv %s644_s18  ;;  %s743_s2 = scalar_lea.vmem (!%p1118_p7), [#allocation3], %s1179_s16 }
 0x108   : > { %714 = vmatpush.bf16.msra.mxu1 %v1177_v16  ;;  %v1200_v26 = vunpack.c.l.bf16 %v1199_v25  ;;  %v1201_v32 = vunpack.c.h.bf16 %v1199_v25 }
 0x10a   : > { %1085 = vmatmul.msk.bf16.vlgmr.msra.gmra.mxu0 %vm614_vm0, %v1170_v19  ;;  %v640_v27 = vmul.f32 0.1, %v1200_v26  ;;  %v641_v34 = vmul.f32 0.1, %v1201_v32 }
 0x10c   : > { %715 = vmatpush.bf16.msra.mxu1 %v1176_v17 }
 0x110   : > { %716 = vmatpush.bf16.msra.mxu1 %v1175_v20 }
 0x114   : > { %717 = vmatpush.bf16.msra.mxu1 %v1174_v21 }
 0x118   : > { %718 = vmatpush.bf16.msra.mxu1 %v1173_v22 }
 0x11c   : > { %719 = vmatpush.bf16.msra.mxu1 %v1172_v23 }
 0x120   : > { %720 = vmatpush.bf16.msra.mxu1 %v1171_v24 }
 0x187   : > { %v627_v28 = vpop.f32.mrf.mxu0 }
 0x188   : > { %v632_v29 = vmul.f32 0.9, %v627_v28 }
 0x18a   : > { %v642_v31 = vadd.f32 %v640_v27, %v632_v29 }
 0x18c   : > { %v646_v33 = vmul.f32 %v645_v30, %v642_v31 }
 0x18f   : > { %v629_v35 = vpop.f32.mrf.mxu0 }
 0x190   : > { %v633_v36 = vmul.f32 0.9, %v629_v35 }
 0x192   : > { %v643_v37 = vadd.f32 %v641_v34, %v633_v36 }
 0x194   : > { %v647_v38 = vmul.f32 %v645_v30, %v643_v37  ;;  %v648_v39 = vpack.c.bf16 %v643_v37, %v642_v31 }
 0x196   : > { %721 = vmatmul.bf16.vlgmr.msra.gmra.mxu1 %v648_v39 }
 0x213   : > { %v722_v41 = vpop.f32.mrf.mxu1 }
 0x214   : > { %v728_v42 = vmul.f32 %v727_v40, %v722_v41 }
 0x216   : > { %v730_v43 = vadd.f32 %v728_v42, %v646_v33 }
 0x218   : > { %v732_v44 = vmax.f32 %v730_v43, 0.0 }
 0x21b   : > { %v724_v45 = vpop.f32.mrf.mxu1 }
 0x21c   : > { %v729_v46 = vmul.f32 %v727_v40, %v724_v45  ;;  %737 = sbr.rel (%p1118_p7) target bundleno = 549 (0x225), region = 88 }
 0x21e   : > { %v731_v47 = vadd.f32 %v729_v46, %v647_v38 }
 0x220   : > { %v733_v48 = vmax.f32 %v731_v47, 0.0 }
 0x222   : > { %v1205_v49 = vpack.c.bf16 %v733_v48, %v732_v44 }
 0x224   : > { %1206 = vst [vmem:[%s743_s2] sm:$0xff] %v1205_v49  }
 0x225 PF: > { %p1121_p8 = scmp.ne.s32.totalorder %s1590_s30, 3 }
 0x227   : > { %749 = sbr.rel (%p1121_p8) target bundleno = 725 (0x2d5), region = 92 }
 0x22c   : > { %v1187_v50 = vld [vmem:[#allocation14 + $0x38] sm:$0xff]  ;;  %v1186_v51 = vld [vmem:[#allocation14 + $0x30] sm:$0xff]  ;;  %v1185_v52 = vld [vmem:[#allocation14 + $0x28] sm:$0xff]  ;;  %v750_v58 = vpack.c.bf16 %v733_v48, %v732_v44 }
 0x22d   : > { %819 = vmatpush.bf16.msra.mxu0 %v1187_v50  ;;  %v1184_v53 = vld [vmem:[#allocation14 + $0x20] sm:$0xff]  ;;  %v1183_v54 = vld [vmem:[#allocation14 + $0x18] sm:$0xff]  ;;  %v1182_v55 = vld [vmem:[#allocation14 + $0x10] sm:$0xff] }
 0x22e   : > { %v1181_v56 = vld [vmem:[#allocation14 + $0x8] sm:$0xff]  ;;  %v1180_v57 = vld [vmem:[#allocation14] sm:$0xff]  ;;  %v1330_v59 = vld [vmem:[%s1876_s7] ss:$0 sm:$0xff] }
 0x231   : > { %820 = vmatpush.bf16.msra.mxu0 %v1186_v51 }
 0x235   : > { %821 = vmatpush.bf16.msra.mxu0 %v1185_v52 }
 0x239   : > { %822 = vmatpush.bf16.msra.mxu0 %v1184_v53 }
 0x23d   : > { %823 = vmatpush.bf16.msra.mxu0 %v1183_v54 }
 0x241   : > { %824 = vmatpush.bf16.msra.mxu0 %v1182_v55 }
 0x245   : > { %825 = vmatpush.bf16.msra.mxu0 %v1181_v56 }
 0x249   : > { %826 = vmatpush.bf16.msra.mxu0 %v1180_v57 }
 0x24c   : > { %827 = vmatmul.bf16.vlgmr.msra.gmra.mxu0 %v750_v58 }
 0x2c9   : > { %v828_v60 = vpop.f32.mrf.mxu0 }
 0x2ca   : > { %v829_v61 = vadd.f32 %v1330_v59, %v828_v60 }
 0x2cc   : > { %833 = vst [vmem:[#allocation15] sm:$0xff] %v829_v61 }
 0x2d1   : > { %v830_v62 = vpop.f32.mrf.mxu0 }
 0x2d2   : > { %v831_v63 = vadd.f32 %v1330_v59, %v830_v62 }
 0x2d4   : > { %834 = vst [vmem:[#allocation15 + $0x8] sm:$0xff] %v831_v63 }
 0x2d5 PF: > { %p1268_p9 = scmp.eq.s32.totalorder %s1684_s11, 3  ;;  %s852_s6 = sshll.u32 %s1877_s8, 4  ;;  %s853_s6 = int_to_ptr.hbm [resolvable:$true] %s852_s6 }
 0x2d6   : > { %s1607_s14 = smov [#allocation15]   ;;  %s1608_s24 = smov 128  }
 0x2d7   : > { %s850_s13 = sshll.u32 %s1607_s14, 4  ;;  %s1609_s25 = smov 8   ;;  %s851_s13 = int_to_ptr.vmem [resolvable:$true] %s850_s13 }
 0x2d8   : > { %1230 = dma.vmem_to_hbm [thread:$0]  (%p1268_p9), %s851_s13, 256, %s853_s6, [#allocation6], %s1608_s24, %s1608_s24, %s1609_s25  }
 0x2d9 PF: > { %p1269_p10 = scmp.ge.s32.totalorder %s1598_s10, 2  ;;  %s1898_s27 = sadd.s32 4294967294, %s1598_s10  }
 0x2da   : > { %p1270_p11 = scmp.eq.s32.totalorder %s1898_s27, 3 }
 0x2dc   : > { %p1254_p12 = pnand %p1270_p11, %p1269_p10 }
 0x2de   : > { %p1255_p13 = pneg %p1254_p12 }
 0x2e0   : > { %1573 = dma.done.wait (%p1255_p13), [#allocation6], 256  }
 0x2e1   : > { %1575 = vsyncadd (%p1255_p13), [#allocation6], 4294967040  ;;  %s29_s10 = sadd.s32 1, %s1598_s10   ;;  %s1899_s27 = smov %s1582_s28 }
 0x2e2   : > { %p26_p0 = scmp.ge.s32.totalorder %s29_s10, 6   ;;  %s1900_s28 = smov %s1586_s29 }
 0x2e3   : > { %s1901_s29 = smov %s1776_s1  ;;  %s1902_s30 = smov %s1594_s9 }
 0x2e4   : > { %s1903_s9 = smov %s1905_s22  ;;  %28 = sbr.rel (!%p26_p0) target bundleno = 16 (0x10), region = 150 }
 0x2e9   :  { %874 = vsyncpa [#allocation5], 1 }
 0x2ea   :  { %876 = vsyncpa [#allocation5 + $0x1], 1 }
 0x2eb   :  { %877 = vsyncpa [#allocation10], 1 }
 0x2ec   :  { %879 = vsyncpa [#allocation10 + $0x1], 1 }
 0x2ed   :  { %880 = vsyncpa [#allocation13], 1 }
 0x2ee   :  { %882 = vsyncpa [#allocation13 + $0x1], 1 }
 0x2ef   :  { %883 = vsyncpa [#allocation6], 1 }
 0x2f0   :  { %885 = vsyncpa [#allocation6 + $0x1], 1 }
 0x2f1   :  { %886 = vsyncpa [#allocation7], 1 }
 0x2f2   :  { %888 = vsyncpa [#allocation7 + $0x1], 1 }

</bundles_post_ra>
